<compile_context>
chip_gen: v6e
topology: v6e:2x2x1
jax: 0.10.0
libtpu: 0.0.40
codegen_flags: <defaults>
</compile_context>

<pallas_src>
import jax
import jax.numpy as jnp
from jax import lax
from jax.experimental import pallas as pl
from jax.experimental.pallas import tpu as pltpu


def residual_block(x_nchw, w1, b1, w2, b2):
    """x_nchw: (N, C, H, W) f32; w*: (Cout, Cin, 3, 3) torch OIHW; b*: (C,)."""
    N, C, H, W = x_nchw.shape
    HW = H * W
    PAD = W + 1                      # flat halo width (one image row + one col)
    P = HW + 2 * PAD                 # flat padded length

    # Free reshapes / repacks (no HBM transpose round trips).
    x_flat = x_nchw.reshape(N, C, HW)
    # (Cout, Cin, kh, kw) -> (Cout, kh, kw, Cin) -> (Cout, 9*Cin);
    # row-major (kh, kw, cin) matches the tap order built inside the kernel.
    w1k = jnp.transpose(w1, (0, 2, 3, 1)).reshape(C, 9 * C)
    w2k = jnp.transpose(w2, (0, 2, 3, 1)).reshape(C, 9 * C)
    b1k = b1.reshape(C, 1)
    b2k = b2.reshape(C, 1)

    def kernel(x_ref, w1_ref, b1_ref, w2_ref, b2_ref,
               out_ref, xpad_ref, hpad_ref, patch_ref):
        # x_ref/out_ref: (1, C, HW); w*: (C, 9C); b*: (C, 1)
        # xpad_ref/hpad_ref: (C, P) flat padded scratch, zero halos of PAD.
        # patch_ref: (9C, HW) im2col patches (K on sublanes, HW on lanes).

        # Re-zero only the halos; interiors are fully rewritten every step.
        zhalo = jnp.zeros((C, PAD), jnp.float32)
        xpad_ref[:, :PAD] = zhalo
        xpad_ref[:, PAD + HW:] = zhalo
        hpad_ref[:, :PAD] = zhalo
        hpad_ref[:, PAD + HW:] = zhalo

        # Column-edge validity masks (tap column w-1 / w+1 falls off the image).
        col = lax.broadcasted_iota(jnp.int32, (C, HW), 1) % W
        mask_l = col > 0           # dw == 0 taps read column w-1
        mask_r = col < (W - 1)     # dw == 2 taps read column w+1

        def build_patches(src_ref):
            # tap(dh, dw)[c, h*W + w] = src[c, PAD + (h+dh-1)*W + (w+dw-1)]
            #                         = src[c, (dh*W + dw) + h*W + w]
            for dh in range(3):
                for dw in range(3):
                    off = dh * W + dw
                    tap = src_ref[:, off:off + HW]        # (C, HW) static slice
                    if dw == 0:
                        tap = jnp.where(mask_l, tap, 0.0)
                    elif dw == 2:
                        tap = jnp.where(mask_r, tap, 0.0)
                    t = dh * 3 + dw
                    patch_ref[t * C:(t + 1) * C, :] = tap

        def conv(w_ref, b_ref):
            # (C, 9C) @ (9C, HW) -> (C, HW): MXU N = HW is lane-dense.
            return jnp.dot(w_ref[...], patch_ref[...],
                           preferred_element_type=jnp.float32) + b_ref[...]

        # Stage the input into the padded scratch interior.
        xpad_ref[:, PAD:PAD + HW] = x_ref[0].astype(jnp.float32)

        # conv1 + ReLU.
        build_patches(xpad_ref)
        h = jnp.maximum(conv(w1_ref, b1_ref), 0.0)
        hpad_ref[:, PAD:PAD + HW] = h

        # conv2 + residual (x re-loaded right before the add; not kept live).
        build_patches(hpad_ref)
        y = conv(w2_ref, b2_ref) + x_ref[0].astype(jnp.float32)
        out_ref[0] = y.astype(out_ref.dtype)

    out_flat = pl.pallas_call(
        kernel,
        out_shape=jax.ShapeDtypeStruct((N, C, HW), x_nchw.dtype),
        grid_spec=pltpu.PrefetchScalarGridSpec(
            num_scalar_prefetch=0,
            grid=(N,),
            in_specs=[
                pl.BlockSpec((1, C, HW), lambda n: (n, 0, 0)),
                pl.BlockSpec((C, 9 * C), lambda n: (0, 0)),
                pl.BlockSpec((C, 1), lambda n: (0, 0)),
                pl.BlockSpec((C, 9 * C), lambda n: (0, 0)),
                pl.BlockSpec((C, 1), lambda n: (0, 0)),
            ],
            out_specs=pl.BlockSpec((1, C, HW), lambda n: (n, 0, 0)),
            scratch_shapes=[
                pltpu.VMEM((C, P), jnp.float32),         # padded flat input
                pltpu.VMEM((C, P), jnp.float32),         # padded flat conv1 out
                pltpu.VMEM((9 * C, HW), jnp.float32),    # im2col patches
            ],
        ),
        compiler_params=pltpu.CompilerParams(
            dimension_semantics=("parallel",),
            vmem_limit_bytes=32 * 1024 * 1024,
        ),
    )(x_flat, w1k, b1k, w2k, b2k)
    return out_flat.reshape(N, C, H, W)


def _reference_forward(x, w1, b1, w2, b2):
    """Pure-JAX reference matching torch nn.Conv2d semantics (NCHW, OIHW)."""
    dn = ("NCHW", "OIHW", "NCHW")
    h = lax.conv_general_dilated(x, w1, (1, 1), ((1, 1), (1, 1)),
                                 dimension_numbers=dn) + b1[None, :, None, None]
    h = jnp.maximum(h, 0.0)
    o = lax.conv_general_dilated(h, w2, (1, 1), ((1, 1), (1, 1)),
                                 dimension_numbers=dn) + b2[None, :, None, None]
    return o + x


if __name__ == "__main__":
    N, C, H, W = 2, 4, 16, 16
    key = jax.random.PRNGKey(0)
    kx, k1, k2, k3, k4 = jax.random.split(key, 5)

    x = jax.random.normal(kx, (N, C, H, W), dtype=jnp.float32)
    # Synthetic parameters (shapes follow nn.Conv2d(dim, dim, 3, padding=1)).
    w1 = 0.1 * jax.random.normal(k1, (C, C, 3, 3), dtype=jnp.float32)
    b1 = 0.1 * jax.random.normal(k2, (C,), dtype=jnp.float32)
    w2 = 0.1 * jax.random.normal(k3, (C, C, 3, 3), dtype=jnp.float32)
    b2 = 0.1 * jax.random.normal(k4, (C,), dtype=jnp.float32)

    out = jax.block_until_ready(residual_block(x, w1, b1, w2, b2))
    ref = jax.block_until_ready(_reference_forward(x, w1, b1, w2, b2))

    assert out.shape == (N, C, H, W)
    assert jnp.allclose(out, ref, atol=1e-4, rtol=1e-4), \
        f"max abs err = {jnp.max(jnp.abs(out - ref))}"
    print("KERNEL_OK")
</pallas_src>

<mosaic_0001>
module attributes {stable_mosaic.version = 11 : i64} {
  func.func @kernel(%arg0: i32, %arg1: memref<1x4x256xf32, #tpu.memory_space<vmem>>, %arg2: memref<4x36xf32, #tpu.memory_space<vmem>>, %arg3: memref<4x1xf32, #tpu.memory_space<vmem>>, %arg4: memref<4x36xf32, #tpu.memory_space<vmem>>, %arg5: memref<4x1xf32, #tpu.memory_space<vmem>>, %arg6: memref<1x4x256xf32, #tpu.memory_space<vmem>>, %arg7: memref<4x290xf32, #tpu.memory_space<vmem>>, %arg8: memref<4x290xf32, #tpu.memory_space<vmem>>, %arg9: memref<36x256xf32, #tpu.memory_space<vmem>>) attributes {dimension_semantics = [#tpu.dimension_semantics<parallel>], iteration_bounds = array<i64: 2>, scalar_prefetch = 0 : i64, scratch_operands = 3 : i64, tpu.core_type = #tpu.core_type<tc>, window_params = [{transform_indices = @transform_0, window_bounds = array<i64: 1, 4, 256>}, {pipeline_mode = #tpu.pipeline_mode<synchronous>, transform_indices = @transform_1, window_bounds = array<i64: 4, 36>}, {pipeline_mode = #tpu.pipeline_mode<synchronous>, transform_indices = @transform_2, window_bounds = array<i64: 4, 1>}, {pipeline_mode = #tpu.pipeline_mode<synchronous>, transform_indices = @transform_3, window_bounds = array<i64: 4, 36>}, {pipeline_mode = #tpu.pipeline_mode<synchronous>, transform_indices = @transform_4, window_bounds = array<i64: 4, 1>}, {transform_indices = @transform_5, window_bounds = array<i64: 1, 4, 256>}]} {
    %cst = arith.constant 0.000000e+00 : f32
    %0 = vector.broadcast %cst : f32 to vector<4x17xf32>
    %c0 = arith.constant 0 : index
    %c0_0 = arith.constant 0 : index
    %1 = vector.load %arg7[%c0, %c0_0] : memref<4x290xf32, #tpu.memory_space<vmem>>, vector<4x17xf32>
    tpu.vector_store %arg7[%c0, %c0_0], %0 {strides = array<i32>} : memref<4x290xf32, #tpu.memory_space<vmem>>, vector<4x17xf32>,
    %c0_1 = arith.constant 0 : index
    %c273 = arith.constant 273 : index
    %2 = vector.load %arg7[%c0_1, %c273] : memref<4x290xf32, #tpu.memory_space<vmem>>, vector<4x17xf32>
    tpu.vector_store %arg7[%c0_1, %c273], %0 {strides = array<i32>} : memref<4x290xf32, #tpu.memory_space<vmem>>, vector<4x17xf32>,
    %c0_2 = arith.constant 0 : index
    %c0_3 = arith.constant 0 : index
    %3 = vector.load %arg8[%c0_2, %c0_3] : memref<4x290xf32, #tpu.memory_space<vmem>>, vector<4x17xf32>
    tpu.vector_store %arg8[%c0_2, %c0_3], %0 {strides = array<i32>} : memref<4x290xf32, #tpu.memory_space<vmem>>, vector<4x17xf32>,
    %c0_4 = arith.constant 0 : index
    %c273_5 = arith.constant 273 : index
    %4 = vector.load %arg8[%c0_4, %c273_5] : memref<4x290xf32, #tpu.memory_space<vmem>>, vector<4x17xf32>
    tpu.vector_store %arg8[%c0_4, %c273_5], %0 {strides = array<i32>} : memref<4x290xf32, #tpu.memory_space<vmem>>, vector<4x17xf32>,
    %5 = tpu.iota {dimensions = array<i32: 1>} : vector<4x256xi32>
    %c16_i32 = arith.constant 16 : i32
    %c0_i32 = arith.constant 0 : i32
    %6 = arith.cmpi eq, %c16_i32, %c0_i32 : i32
    %c1_i32 = arith.constant 1 : i32
    %7 = arith.select %6, %c1_i32, %c16_i32 : i32
    %8 = vector.broadcast %7 : i32 to vector<4x256xi32>
    %9 = arith.remsi %5, %8 : vector<4x256xi32>
    %c0_i32_6 = arith.constant 0 : i32
    %10 = vector.broadcast %c0_i32_6 : i32 to vector<4x256xi32>
    %11 = arith.cmpi ne, %9, %10 : vector<4x256xi32>
    %c0_i32_7 = arith.constant 0 : i32
    %12 = vector.broadcast %c0_i32_7 : i32 to vector<4x256xi32>
    %13 = arith.cmpi slt, %9, %12 : vector<4x256xi32>
    %c0_i32_8 = arith.constant 0 : i32
    %14 = arith.cmpi slt, %7, %c0_i32_8 : i32
    %15 = vector.broadcast %14 : i1 to vector<4x256xi1>
    %16 = vector.broadcast %15 : vector<4x256xi1> to vector<4x256xi1>
    %17 = arith.xori %13, %16 : vector<4x256xi1>
    %18 = arith.andi %17, %11 : vector<4x256xi1>
    %19 = vector.broadcast %7 : i32 to vector<4x256xi32>
    %20 = arith.addi %9, %19 : vector<4x256xi32>
    %21 = arith.select %18, %20, %9 : vector<4x256xi1>, vector<4x256xi32>
    %c0_i32_9 = arith.constant 0 : i32
    %22 = vector.broadcast %c0_i32_9 : i32 to vector<4x256xi32>
    %23 = arith.cmpi sgt, %21, %22 : vector<4x256xi32>
    %c15_i32 = arith.constant 15 : i32
    %24 = vector.broadcast %c15_i32 : i32 to vector<4x256xi32>
    %25 = arith.cmpi slt, %21, %24 : vector<4x256xi32>
    %c0_10 = arith.constant 0 : index
    %c0_11 = arith.constant 0 : index
    %c0_12 = arith.constant 0 : index
    %26 = vector.load %arg1[%c0_10, %c0_11, %c0_12] : memref<1x4x256xf32, #tpu.memory_space<vmem>>, vector<1x4x256xf32>
    %27 = vector.shape_cast %26 : vector<1x4x256xf32> to vector<4x256xf32>
    %c0_13 = arith.constant 0 : index
    %c17 = arith.constant 17 : index
    %28 = vector.load %arg7[%c0_13, %c17] : memref<4x290xf32, #tpu.memory_space<vmem>>, vector<4x256xf32>
    tpu.vector_store %arg7[%c0_13, %c17], %27 {strides = array<i32>} : memref<4x290xf32, #tpu.memory_space<vmem>>, vector<4x256xf32>,
    %c0_14 = arith.constant 0 : index
    %c0_15 = arith.constant 0 : index
    %29 = vector.load %arg7[%c0_14, %c0_15] : memref<4x290xf32, #tpu.memory_space<vmem>>, vector<4x256xf32>
    %cst_16 = arith.constant 0.000000e+00 : f32
    %30 = vector.broadcast %cst_16 : f32 to vector<4x256xf32>
    %31 = arith.select %23, %29, %30 : vector<4x256xi1>, vector<4x256xf32>
    %c0_17 = arith.constant 0 : index
    %c0_18 = arith.constant 0 : index
    %32 = vector.load %arg9[%c0_17, %c0_18] : memref<36x256xf32, #tpu.memory_space<vmem>>, vector<4x256xf32>
    tpu.vector_store %arg9[%c0_17, %c0_18], %31 {strides = array<i32>} : memref<36x256xf32, #tpu.memory_space<vmem>>, vector<4x256xf32>,
    %c0_19 = arith.constant 0 : index
    %c1 = arith.constant 1 : index
    %33 = vector.load %arg7[%c0_19, %c1] : memref<4x290xf32, #tpu.memory_space<vmem>>, vector<4x256xf32>
    %c4 = arith.constant 4 : index
    %c0_20 = arith.constant 0 : index
    %34 = vector.load %arg9[%c4, %c0_20] : memref<36x256xf32, #tpu.memory_space<vmem>>, vector<4x256xf32>
    tpu.vector_store %arg9[%c4, %c0_20], %33 {strides = array<i32>} : memref<36x256xf32, #tpu.memory_space<vmem>>, vector<4x256xf32>,
    %c0_21 = arith.constant 0 : index
    %c2 = arith.constant 2 : index
    %35 = vector.load %arg7[%c0_21, %c2] : memref<4x290xf32, #tpu.memory_space<vmem>>, vector<4x256xf32>
    %cst_22 = arith.constant 0.000000e+00 : f32
    %36 = vector.broadcast %cst_22 : f32 to vector<4x256xf32>
    %37 = arith.select %25, %35, %36 : vector<4x256xi1>, vector<4x256xf32>
    %c8 = arith.constant 8 : index
    %c0_23 = arith.constant 0 : index
    %38 = vector.load %arg9[%c8, %c0_23] : memref<36x256xf32, #tpu.memory_space<vmem>>, vector<4x256xf32>
    tpu.vector_store %arg9[%c8, %c0_23], %37 {strides = array<i32>} : memref<36x256xf32, #tpu.memory_space<vmem>>, vector<4x256xf32>,
    %c0_24 = arith.constant 0 : index
    %c16 = arith.constant 16 : index
    %39 = vector.load %arg7[%c0_24, %c16] : memref<4x290xf32, #tpu.memory_space<vmem>>, vector<4x256xf32>
    %cst_25 = arith.constant 0.000000e+00 : f32
    %40 = vector.broadcast %cst_25 : f32 to vector<4x256xf32>
    %41 = arith.select %23, %39, %40 : vector<4x256xi1>, vector<4x256xf32>
    %c12 = arith.constant 12 : index
    %c0_26 = arith.constant 0 : index
    %42 = vector.load %arg9[%c12, %c0_26] : memref<36x256xf32, #tpu.memory_space<vmem>>, vector<4x256xf32>
    tpu.vector_store %arg9[%c12, %c0_26], %41 {strides = array<i32>} : memref<36x256xf32, #tpu.memory_space<vmem>>, vector<4x256xf32>,
    %c0_27 = arith.constant 0 : index
    %c17_28 = arith.constant 17 : index
    %43 = vector.load %arg7[%c0_27, %c17_28] : memref<4x290xf32, #tpu.memory_space<vmem>>, vector<4x256xf32>
    %c16_29 = arith.constant 16 : index
    %c0_30 = arith.constant 0 : index
    %44 = vector.load %arg9[%c16_29, %c0_30] : memref<36x256xf32, #tpu.memory_space<vmem>>, vector<4x256xf32>
    tpu.vector_store %arg9[%c16_29, %c0_30], %43 {strides = array<i32>} : memref<36x256xf32, #tpu.memory_space<vmem>>, vector<4x256xf32>,
    %c0_31 = arith.constant 0 : index
    %c18 = arith.constant 18 : index
    %45 = vector.load %arg7[%c0_31, %c18] : memref<4x290xf32, #tpu.memory_space<vmem>>, vector<4x256xf32>
    %cst_32 = arith.constant 0.000000e+00 : f32
    %46 = vector.broadcast %cst_32 : f32 to vector<4x256xf32>
    %47 = arith.select %25, %45, %46 : vector<4x256xi1>, vector<4x256xf32>
    %c20 = arith.constant 20 : index
    %c0_33 = arith.constant 0 : index
    %48 = vector.load %arg9[%c20, %c0_33] : memref<36x256xf32, #tpu.memory_space<vmem>>, vector<4x256xf32>
    tpu.vector_store %arg9[%c20, %c0_33], %47 {strides = array<i32>} : memref<36x256xf32, #tpu.memory_space<vmem>>, vector<4x256xf32>,
    %c0_34 = arith.constant 0 : index
    %c32 = arith.constant 32 : index
    %49 = vector.load %arg7[%c0_34, %c32] : memref<4x290xf32, #tpu.memory_space<vmem>>, vector<4x256xf32>
    %cst_35 = arith.constant 0.000000e+00 : f32
    %50 = vector.broadcast %cst_35 : f32 to vector<4x256xf32>
    %51 = arith.select %23, %49, %50 : vector<4x256xi1>, vector<4x256xf32>
    %c24 = arith.constant 24 : index
    %c0_36 = arith.constant 0 : index
    %52 = vector.load %arg9[%c24, %c0_36] : memref<36x256xf32, #tpu.memory_space<vmem>>, vector<4x256xf32>
    tpu.vector_store %arg9[%c24, %c0_36], %51 {strides = array<i32>} : memref<36x256xf32, #tpu.memory_space<vmem>>, vector<4x256xf32>,
    %c0_37 = arith.constant 0 : index
    %c33 = arith.constant 33 : index
    %53 = vector.load %arg7[%c0_37, %c33] : memref<4x290xf32, #tpu.memory_space<vmem>>, vector<4x256xf32>
    %c28 = arith.constant 28 : index
    %c0_38 = arith.constant 0 : index
    %54 = vector.load %arg9[%c28, %c0_38] : memref<36x256xf32, #tpu.memory_space<vmem>>, vector<4x256xf32>
    tpu.vector_store %arg9[%c28, %c0_38], %53 {strides = array<i32>} : memref<36x256xf32, #tpu.memory_space<vmem>>, vector<4x256xf32>,
    %c0_39 = arith.constant 0 : index
    %c34 = arith.constant 34 : index
    %55 = vector.load %arg7[%c0_39, %c34] : memref<4x290xf32, #tpu.memory_space<vmem>>, vector<4x256xf32>
    %cst_40 = arith.constant 0.000000e+00 : f32
    %56 = vector.broadcast %cst_40 : f32 to vector<4x256xf32>
    %57 = arith.select %25, %55, %56 : vector<4x256xi1>, vector<4x256xf32>
    %c32_41 = arith.constant 32 : index
    %c0_42 = arith.constant 0 : index
    %58 = vector.load %arg9[%c32_41, %c0_42] : memref<36x256xf32, #tpu.memory_space<vmem>>, vector<4x256xf32>
    tpu.vector_store %arg9[%c32_41, %c0_42], %57 {strides = array<i32>} : memref<36x256xf32, #tpu.memory_space<vmem>>, vector<4x256xf32>,
    %c0_43 = arith.constant 0 : index
    %c0_44 = arith.constant 0 : index
    %59 = vector.load %arg2[%c0_43, %c0_44] : memref<4x36xf32, #tpu.memory_space<vmem>>, vector<4x36xf32>
    %c0_45 = arith.constant 0 : index
    %c0_46 = arith.constant 0 : index
    %60 = vector.load %arg9[%c0_45, %c0_46] : memref<36x256xf32, #tpu.memory_space<vmem>>, vector<36x256xf32>
    %cst_47 = arith.constant dense<0.000000e+00> : vector<4x256xf32>
    %61 = tpu.matmul %59, %60, %cst_47 {dimension_numbers = #tpu.dot_dimension_numbers<[1], [0], [0], [1], [0, 0, 1, 1], [], []>} : vector<4x36xf32>, vector<36x256xf32>, vector<4x256xf32> -> vector<4x256xf32>
    %c0_48 = arith.constant 0 : index
    %c0_49 = arith.constant 0 : index
    %62 = vector.load %arg3[%c0_48, %c0_49] : memref<4x1xf32, #tpu.memory_space<vmem>>, vector<4x1xf32>
    %63 = vector.broadcast %62 : vector<4x1xf32> to vector<4x256xf32>
    %64 = arith.addf %61, %63 : vector<4x256xf32>
    %cst_50 = arith.constant 0.000000e+00 : f32
    %65 = vector.broadcast %cst_50 : f32 to vector<4x256xf32>
    %66 = arith.maximumf %64, %65 : vector<4x256xf32>
    %c0_51 = arith.constant 0 : index
    %c17_52 = arith.constant 17 : index
    %67 = vector.load %arg8[%c0_51, %c17_52] : memref<4x290xf32, #tpu.memory_space<vmem>>, vector<4x256xf32>
    tpu.vector_store %arg8[%c0_51, %c17_52], %66 {strides = array<i32>} : memref<4x290xf32, #tpu.memory_space<vmem>>, vector<4x256xf32>,
    %c0_53 = arith.constant 0 : index
    %c0_54 = arith.constant 0 : index
    %68 = vector.load %arg8[%c0_53, %c0_54] : memref<4x290xf32, #tpu.memory_space<vmem>>, vector<4x256xf32>
    %cst_55 = arith.constant 0.000000e+00 : f32
    %69 = vector.broadcast %cst_55 : f32 to vector<4x256xf32>
    %70 = arith.select %23, %68, %69 : vector<4x256xi1>, vector<4x256xf32>
    %c0_56 = arith.constant 0 : index
    %c0_57 = arith.constant 0 : index
    %71 = vector.load %arg9[%c0_56, %c0_57] : memref<36x256xf32, #tpu.memory_space<vmem>>, vector<4x256xf32>
    tpu.vector_store %arg9[%c0_56, %c0_57], %70 {strides = array<i32>} : memref<36x256xf32, #tpu.memory_space<vmem>>, vector<4x256xf32>,
    %c0_58 = arith.constant 0 : index
    %c1_59 = arith.constant 1 : index
    %72 = vector.load %arg8[%c0_58, %c1_59] : memref<4x290xf32, #tpu.memory_space<vmem>>, vector<4x256xf32>
    %c4_60 = arith.constant 4 : index
    %c0_61 = arith.constant 0 : index
    %73 = vector.load %arg9[%c4_60, %c0_61] : memref<36x256xf32, #tpu.memory_space<vmem>>, vector<4x256xf32>
    tpu.vector_store %arg9[%c4_60, %c0_61], %72 {strides = array<i32>} : memref<36x256xf32, #tpu.memory_space<vmem>>, vector<4x256xf32>,
    %c0_62 = arith.constant 0 : index
    %c2_63 = arith.constant 2 : index
    %74 = vector.load %arg8[%c0_62, %c2_63] : memref<4x290xf32, #tpu.memory_space<vmem>>, vector<4x256xf32>
    %cst_64 = arith.constant 0.000000e+00 : f32
    %75 = vector.broadcast %cst_64 : f32 to vector<4x256xf32>
    %76 = arith.select %25, %74, %75 : vector<4x256xi1>, vector<4x256xf32>
    %c8_65 = arith.constant 8 : index
    %c0_66 = arith.constant 0 : index
    %77 = vector.load %arg9[%c8_65, %c0_66] : memref<36x256xf32, #tpu.memory_space<vmem>>, vector<4x256xf32>
    tpu.vector_store %arg9[%c8_65, %c0_66], %76 {strides = array<i32>} : memref<36x256xf32, #tpu.memory_space<vmem>>, vector<4x256xf32>,
    %c0_67 = arith.constant 0 : index
    %c16_68 = arith.constant 16 : index
    %78 = vector.load %arg8[%c0_67, %c16_68] : memref<4x290xf32, #tpu.memory_space<vmem>>, vector<4x256xf32>
    %cst_69 = arith.constant 0.000000e+00 : f32
    %79 = vector.broadcast %cst_69 : f32 to vector<4x256xf32>
    %80 = arith.select %23, %78, %79 : vector<4x256xi1>, vector<4x256xf32>
    %c12_70 = arith.constant 12 : index
    %c0_71 = arith.constant 0 : index
    %81 = vector.load %arg9[%c12_70, %c0_71] : memref<36x256xf32, #tpu.memory_space<vmem>>, vector<4x256xf32>
    tpu.vector_store %arg9[%c12_70, %c0_71], %80 {strides = array<i32>} : memref<36x256xf32, #tpu.memory_space<vmem>>, vector<4x256xf32>,
    %c0_72 = arith.constant 0 : index
    %c17_73 = arith.constant 17 : index
    %82 = vector.load %arg8[%c0_72, %c17_73] : memref<4x290xf32, #tpu.memory_space<vmem>>, vector<4x256xf32>
    %c16_74 = arith.constant 16 : index
    %c0_75 = arith.constant 0 : index
    %83 = vector.load %arg9[%c16_74, %c0_75] : memref<36x256xf32, #tpu.memory_space<vmem>>, vector<4x256xf32>
    tpu.vector_store %arg9[%c16_74, %c0_75], %82 {strides = array<i32>} : memref<36x256xf32, #tpu.memory_space<vmem>>, vector<4x256xf32>,
    %c0_76 = arith.constant 0 : index
    %c18_77 = arith.constant 18 : index
    %84 = vector.load %arg8[%c0_76, %c18_77] : memref<4x290xf32, #tpu.memory_space<vmem>>, vector<4x256xf32>
    %cst_78 = arith.constant 0.000000e+00 : f32
    %85 = vector.broadcast %cst_78 : f32 to vector<4x256xf32>
    %86 = arith.select %25, %84, %85 : vector<4x256xi1>, vector<4x256xf32>
    %c20_79 = arith.constant 20 : index
    %c0_80 = arith.constant 0 : index
    %87 = vector.load %arg9[%c20_79, %c0_80] : memref<36x256xf32, #tpu.memory_space<vmem>>, vector<4x256xf32>
    tpu.vector_store %arg9[%c20_79, %c0_80], %86 {strides = array<i32>} : memref<36x256xf32, #tpu.memory_space<vmem>>, vector<4x256xf32>,
    %c0_81 = arith.constant 0 : index
    %c32_82 = arith.constant 32 : index
    %88 = vector.load %arg8[%c0_81, %c32_82] : memref<4x290xf32, #tpu.memory_space<vmem>>, vector<4x256xf32>
    %cst_83 = arith.constant 0.000000e+00 : f32
    %89 = vector.broadcast %cst_83 : f32 to vector<4x256xf32>
    %90 = arith.select %23, %88, %89 : vector<4x256xi1>, vector<4x256xf32>
    %c24_84 = arith.constant 24 : index
    %c0_85 = arith.constant 0 : index
    %91 = vector.load %arg9[%c24_84, %c0_85] : memref<36x256xf32, #tpu.memory_space<vmem>>, vector<4x256xf32>
    tpu.vector_store %arg9[%c24_84, %c0_85], %90 {strides = array<i32>} : memref<36x256xf32, #tpu.memory_space<vmem>>, vector<4x256xf32>,
    %c0_86 = arith.constant 0 : index
    %c33_87 = arith.constant 33 : index
    %92 = vector.load %arg8[%c0_86, %c33_87] : memref<4x290xf32, #tpu.memory_space<vmem>>, vector<4x256xf32>
    %c28_88 = arith.constant 28 : index
    %c0_89 = arith.constant 0 : index
    %93 = vector.load %arg9[%c28_88, %c0_89] : memref<36x256xf32, #tpu.memory_space<vmem>>, vector<4x256xf32>
    tpu.vector_store %arg9[%c28_88, %c0_89], %92 {strides = array<i32>} : memref<36x256xf32, #tpu.memory_space<vmem>>, vector<4x256xf32>,
    %c0_90 = arith.constant 0 : index
    %c34_91 = arith.constant 34 : index
    %94 = vector.load %arg8[%c0_90, %c34_91] : memref<4x290xf32, #tpu.memory_space<vmem>>, vector<4x256xf32>
    %cst_92 = arith.constant 0.000000e+00 : f32
    %95 = vector.broadcast %cst_92 : f32 to vector<4x256xf32>
    %96 = arith.select %25, %94, %95 : vector<4x256xi1>, vector<4x256xf32>
    %c32_93 = arith.constant 32 : index
    %c0_94 = arith.constant 0 : index
    %97 = vector.load %arg9[%c32_93, %c0_94] : memref<36x256xf32, #tpu.memory_space<vmem>>, vector<4x256xf32>
    tpu.vector_store %arg9[%c32_93, %c0_94], %96 {strides = array<i32>} : memref<36x256xf32, #tpu.memory_space<vmem>>, vector<4x256xf32>,
    %c0_95 = arith.constant 0 : index
    %c0_96 = arith.constant 0 : index
    %98 = vector.load %arg4[%c0_95, %c0_96] : memref<4x36xf32, #tpu.memory_space<vmem>>, vector<4x36xf32>
    %c0_97 = arith.constant 0 : index
    %c0_98 = arith.constant 0 : index
    %99 = vector.load %arg9[%c0_97, %c0_98] : memref<36x256xf32, #tpu.memory_space<vmem>>, vector<36x256xf32>
    %cst_99 = arith.constant dense<0.000000e+00> : vector<4x256xf32>
    %100 = tpu.matmul %98, %99, %cst_99 {dimension_numbers = #tpu.dot_dimension_numbers<[1], [0], [0], [1], [0, 0, 1, 1], [], []>} : vector<4x36xf32>, vector<36x256xf32>, vector<4x256xf32> -> vector<4x256xf32>
    %c0_100 = arith.constant 0 : index
    %c0_101 = arith.constant 0 : index
    %101 = vector.load %arg5[%c0_100, %c0_101] : memref<4x1xf32, #tpu.memory_space<vmem>>, vector<4x1xf32>
    %102 = vector.broadcast %101 : vector<4x1xf32> to vector<4x256xf32>
    %103 = arith.addf %100, %102 : vector<4x256xf32>
    %c0_102 = arith.constant 0 : index
    %c0_103 = arith.constant 0 : index
    %c0_104 = arith.constant 0 : index
    %104 = vector.load %arg1[%c0_102, %c0_103, %c0_104] : memref<1x4x256xf32, #tpu.memory_space<vmem>>, vector<1x4x256xf32>
    %105 = vector.shape_cast %104 : vector<1x4x256xf32> to vector<4x256xf32>
    %106 = arith.addf %103, %105 : vector<4x256xf32>
    %c0_105 = arith.constant 0 : index
    %c0_106 = arith.constant 0 : index
    %c0_107 = arith.constant 0 : index
    %107 = vector.load %arg6[%c0_105, %c0_106, %c0_107] : memref<1x4x256xf32, #tpu.memory_space<vmem>>, vector<1x4x256xf32>
    %108 = vector.shape_cast %107 : vector<1x4x256xf32> to vector<4x256xf32>
    %109 = vector.shape_cast %106 : vector<4x256xf32> to vector<1x4x256xf32>
    tpu.vector_store %arg6[%c0_105, %c0_106, %c0_107], %109 {strides = array<i32>} : memref<1x4x256xf32, #tpu.memory_space<vmem>>, vector<1x4x256xf32>,
    return
  }
  func.func @transform_0(%arg0: i32) -> (i32, i32, i32) {
    %c0_i32 = arith.constant 0 : i32
    %c0_i32_0 = arith.constant 0 : i32
    %c0_i32_1 = arith.constant 0 : i32
    return %arg0, %c0_i32, %c0_i32_0 : i32, i32, i32
  }
  func.func @transform_1(%arg0: i32) -> (i32, i32) {
    %c0_i32 = arith.constant 0 : i32
    %c0_i32_0 = arith.constant 0 : i32
    %c0_i32_1 = arith.constant 0 : i32
    return %c0_i32, %c0_i32_0 : i32, i32
  }
  func.func @transform_2(%arg0: i32) -> (i32, i32) {
    %c0_i32 = arith.constant 0 : i32
    %c0_i32_0 = arith.constant 0 : i32
    %c0_i32_1 = arith.constant 0 : i32
    return %c0_i32, %c0_i32_0 : i32, i32
  }
  func.func @transform_3(%arg0: i32) -> (i32, i32) {
    %c0_i32 = arith.constant 0 : i32
    %c0_i32_0 = arith.constant 0 : i32
    %c0_i32_1 = arith.constant 0 : i32
    return %c0_i32, %c0_i32_0 : i32, i32
  }
  func.func @transform_4(%arg0: i32) -> (i32, i32) {
    %c0_i32 = arith.constant 0 : i32
    %c0_i32_0 = arith.constant 0 : i32
    %c0_i32_1 = arith.constant 0 : i32
    return %c0_i32, %c0_i32_0 : i32, i32
  }
  func.func @transform_5(%arg0: i32) -> (i32, i32, i32) {
    %c0_i32 = arith.constant 0 : i32
    %c0_i32_0 = arith.constant 0 : i32
    %c0_i32_1 = arith.constant 0 : i32
    return %arg0, %c0_i32, %c0_i32_0 : i32, i32, i32
  }
}

</mosaic_0001>

<bundles_post_ra>
// kernel: tpu_custom_call.1
= control target key start
LH: loop header
LB: loop body
LE: loop exit
PB: predicated region body
PF: predicated region fallthrough
CT: control target
= control target key end

     0   :  { %10 = vsyncpa [#allocation6], 0  ;;  %s1519_s0 = inlined_call_operand.hbm [shape: f32[2,4,256], index: 0, kind: input, shape index: {}]   ;;  %s1520_s1 = inlined_call_operand.vmem [shape: f32[4,36], index: 1, kind: input, shape index: {}]   ;;  %s1521_s2 = inlined_call_operand.vmem [shape: f32[4,1], index: 2, kind: input, shape index: {}]   ;;  %s1522_s3 = inlined_call_operand.vmem [shape: f32[4,36], index: 3, kind: input, shape index: {}]   ;;  %s1523_s4 = inlined_call_operand.vmem [shape: f32[4,1], index: 4, kind: input, shape index: {}]   ;;  %s1524_s5 = inlined_call_operand.hbm [shape: f32[2,4,256], index: 5, kind: output, shape index: {}]  }
   0x1   :  { %12 = vsyncpa [#allocation6 + $0x1], 0 }
   0x2   :  { %13 = vsyncpa [#allocation7], 0 }
   0x3   :  { %15 = vsyncpa [#allocation7 + $0x1], 0  ;;  %s1167_s18 = smov 0   ;;  %s1169_s19 = smov 0  }
   0x4   :  { %s1171_s20 = smov 0   ;;  %s1173_s21 = smov 0  }
   0x5 LB: > { %s1188_s22 = sadd.s32 4294967295, %s1122_s21   ;;  %s941_s23 = sadd.s32 4294967294, %s1122_s21   ;;  %s1122_s21 = sphi %s1173_s21, %s1554_s21   ;;  %s1118_s20 = sphi %s1171_s20, %s1553_s20   ;;  %s1114_s19 = sphi %s1169_s19, %s1552_s19   ;;  %s1110_s18 = sphi %s1167_s18, %s1551_s18  }
   0x6   : > { %s1192_s24 = sadd.s32 1, %s1122_s21   ;;  %s28_s25 = sadd.s32 1, %s1118_s20 }
   0x7   : > { %s25_s26 = ssub.s32 %s1122_s21, %s1192_s24  ;;  %p35_p0 = scmp.ne.s32.totalorder %s1118_s20, %s1114_s19 }
   0x8   : > { %p26_p1 = scmp.eq.s32.totalorder %s25_s26, 0  ;;  %p36_p2 = scmp.eq.s32.totalorder %s1122_s21, 0 }
   0x9   : > { %p41_p3 = scmp.ne.s32.totalorder %s1114_s19, %s1110_s18  ;;  %p42_p4 = scmp.eq.s32.totalorder %s1188_s22, 0 }
   0xa   : > { %s1204_s27 = scalar_select %p26_p1, %s1118_s20, %s28_s25  }
   0xb   : > { %p1206_p5 = por %p36_p2, %p35_p0  ;;  %p1210_p6 = por %p42_p4, %p41_p3 }
   0xc   : > { %p149_p7 = scmp.eq.s32.totalorder %s1188_s22, 1  ;;  %p155_p8 = scmp.eq.s32.totalorder %s941_s23, 1 }
   0xd   : > { %s1529_s29 = scalar_select %p1210_p6, 1, 0 }
   0xe   : > { %p975_p10 = scmp.lt.s32.totalorder %s1122_s21, 2  ;;  %p1217_p11 = por %p149_p7, %p35_p0 }
   0xf   : > { %p1221_p12 = por %p155_p8, %p41_p3  ;;  %s187_s7 = sand.u32 1, %s1118_s20  }
  0x10   : > { %s1530_s30 = scalar_select %p1217_p11, 1, 0 }
  0x11   : > { %s1531_s6 = scalar_select %p1221_p12, 1, 0 }
  0x12   : > { %s961_s8 = sshll.u32 %s1122_s21, 7  ;;  %s944_s9 = sshll.u32 %s187_s7, 3 }
  0x13   : > { %s1230_s12 = scalar_lea.hbm %s1519_s0, %s961_s8  ;;  %s191_s13 = scalar_lea.vmem [#allocation5], %s944_s9 }
  0x14   : > { %s199_s14 = sshll.u32 %s191_s13, 4  ;;  %p1234_p13 = pnand %p975_p10, %p1206_p5  ;;  %s1238_s14 = int_to_ptr.vmem [resolvable:$true] %s199_s14 }
  0x15   : > { %s188_s16 = scalar_lea.sflag [#allocation6], %s187_s7  ;;  %s1030_s17 = scalar_lea.hbm %s1230_s12, 128 }
  0x16   : > { %p1031_p2 = scmp.ne.s32.totalorder %s1230_s12, %s1030_s17  ;;  %p1032_p3 = pneg %p1234_p13 }
  0x17   : > { %s1035_s26 = scalar_lea.hbm %s1519_s0, 256  ;;  %p1036_p5 = scmp.lt.s32.totalorder %s1230_s12, %s1519_s0 }
  0x18   : > { %p1033_p4 = pnand %p1032_p3, %p1031_p2  ;;  %p1037_p8 = scmp.lt.s32.totalorder %s1035_s26, %s1030_s17 }
  0x1a   : > { %p1034_p7 = pneg %p1033_p4  ;;  %p1038_p10 = por %p1037_p8, %p1036_p5 }
  0x1c   : > { %p1039_p9 = pnand %p1038_p10, %p1034_p7 }
  0x1e   : > { %1042 = shalt.err (!%p1039_p9)
}
  0x1f   : > { %s1043_s7 = scalar_lea.vmem %s1238_s14, 128  ;;  %s1124_s9 = smov [#allocation5]  }
  0x20   : > { %p1044_p0 = scmp.ne.s32.totalorder %s1238_s14, %s1043_s7  ;;  %s1048_s10 = sshll.u32 %s1124_s9, 4  ;;  %s1049_s10 = int_to_ptr.vmem [resolvable:$false] %s1048_s10 }
  0x21   : > { %s1050_s11 = scalar_lea.vmem %s1049_s10, 256  ;;  %p1051_p4 = scmp.lt.s32.totalorder %s1238_s14, %s1049_s10 }
  0x22   : > { %p1046_p1 = pnand %p1044_p0, %p1032_p3  ;;  %p1052_p12 = scmp.lt.s32.totalorder %s1050_s11, %s1043_s7 }
  0x24   : > { %p1047_p2 = pneg %p1046_p1  ;;  %p1053_p11 = por %p1052_p12, %p1051_p4 }
  0x26   : > { %p1054_p6 = pnand %p1053_p11, %p1047_p2 }
  0x28   : > { %1057 = shalt.err (!%p1054_p6)
}
  0x29   : > { %970 = dma.hbm_to_vmem [thread:$0]  (!%p1234_p13), %s1230_s12, 128, %s1238_s14, %s188_s16  }
  0x2a   : > { %p1533_p9 = scmp.lt.s32.totalorder %s1122_s21, 3  ;;  %p1534_p7 = scmp.ge.s32.totalorder %s1122_s21, 1 }
  0x2c   : > { %p205_p0 = pnand %p1534_p7, %p1533_p9 }
  0x2d   : > { %s1265_s13 = sand.u32 (!%p205_p0), 1, %s1114_s19   ;;  %p1535_p6 = scmp.ne.s32.totalorder (!%p205_p0), %s1529_s29, 0 }
  0x2e   : > { %208 = sbr.rel (%p205_p0) target bundleno = 1060 (0x424), region = 40  ;;  %s948_s17 = sshll.u32 (!%p205_p0), %s1265_s13, 3 }
  0x2f   : > { %s211_s23 = scalar_lea.sflag (!%p205_p0), [#allocation6], %s1265_s13  ;;  %s214_s15 = scalar_lea.vmem (!%p205_p0), [#allocation5], %s948_s17 }
  0x33   : > { %1101 = dma.done.wait (%p1535_p6), %s211_s23, 128  }
  0x34   : > { %1103 = vsyncadd (%p1535_p6), %s211_s23, 4294967168  ;;  %vm241_vm0 = vcmask 134144   ;;  %vm243_vm1 = vcmask 273544   ;;  %v1125_v0 = vmov 0.0   ;;  %v1277_v1 = vld [vmem:[%s214_s15] sm:$0xff]  ;;  %s1126_s12 = smov 17   ;;  %v247_v2 = vlaneseq }
  0x35   : > { %242 = vst.msk [vmem:[#allocation2] sm:$0xf] %vm241_vm0, %v1125_v0  ;;  %245 = vst.msk [vmem:[#allocation3] sm:$0xf] %vm241_vm0, %v1125_v0  ;;  %560 = vmatprep.mubr.f32.mxu0 %v1125_v0  ;;  %838 = vmatprep.mubr.f32.mxu1 %v1125_v0  ;;  %vm287_vm2 = vcmask 1043592   ;;  %vm288_vm3 = vcmask 1047556  }
  0x36   : > { %244 = vst.msk [vmem:[#allocation2 + $0x8] sm:$0xf] %vm243_vm1, %v1125_v0  ;;  %246 = vst.msk [vmem:[#allocation3 + $0x8] sm:$0xf] %vm243_vm1, %v1125_v0  ;;  %280 = vrot.lane.b32.xlu0 %v1277_v1, %s1126_s12  ;;  %v1281_v3 = vand.u32 127, %v247_v2  ;;  %vm283_vm4 = vcmask 138240  }
  0x37   : > { %vm1283_vm5 = vmor %vm288_vm3, %vm287_vm2  ;;  %s1127_s29 = smov 94   ;;  %s1128_s14 = smov 110   ;;  %v1135_v26 = vmov 0   ;;  %v479_v27 = vld [vmem:[%s1521_s2] sm:$0xf]  ;;  %vm459_vm8 = vcmask 769024  }
  0x38   : > { %v1290_v8 = vadd.s32 128, %v1281_v3  ;;  %v254_v10 = vand.u32 15, %v1281_v3  ;;  %s1129_s16 = smov 95   ;;  %s1130_s25 = smov 96   ;;  %1020 = vset.pattern.permute.xlu1 %v1135_v26  ;;  %1021 = vset.pattern.permute.xlu0 %v1135_v26  ;;  %vm394_vm10 = vcmask 900096   ;;  %vm420_vm12 = vcmask 785408  }
  0x39   : > { %s1131_s26 = smov 111   ;;  %s1132_s28 = smov 112   ;;  %vm1527_vm13 = vcmask 1043456   ;;  %vm350_vm14 = vcmask 916480   ;;  %vm441_vm15 = vcmask 777216   ;;  %vm376_vm1 = vcmask 908288  }
  0x3a   : > { %v261_v9 = vand.u32 15, %v1290_v8  ;;  %vm1305_vm7 = vcmp.gt.s32.totalorder %v254_v10, 0  ;;  %s1133_s8 = smov 127   ;;  %s1134_s7 = smov 126   ;;  %vm1352_vm11 = vcmp.lt.s32.totalorder %v254_v10, 15  ;;  %vm330_vm2 = vcmask 1031168  }
  0x3b   : > { %vm312_vm3 = vcmask 1039360   ;;  %s857_s9 = scalar_lea.sflag [#allocation7], %s1265_s13  ;;  %p1548_p12 = scmp.ne.s32.totalorder %s1530_s30, 0 }
  0x3c   : > { %vm1299_vm6 = vcmp.gt.s32.totalorder %v261_v9, 0  ;;  %vm1343_vm9 = vcmp.lt.s32.totalorder %v261_v9, 15 }
  0xa8   : > { %v281_v4 = vpop.permute.xlu0 %280 }
  0xa9   : > { %v282_v6 = vrot.slane %v281_v4, 4 }
  0xab   : > { %v284_v7 = vsel %vm283_vm4, %v282_v6, %v281_v4  ;;  %291 = vst.msk [vmem:[#allocation2 + $0x8] sm:$0xf] %vm241_vm0, %v282_v6 }
  0xac   : > { %290 = vst.msk [vmem:[#allocation2] sm:$0xff] %vm1283_vm5, %v284_v7 }
  0xb2   : > { %v449_v11 = vld [vmem:[#allocation2 + $0x8] sm:$0xf] }
  0xb3   : > { %457 = vrot.lane.b32.xlu1 %v449_v11, %s1127_s29  ;;  %v383_v12 = vld [vmem:[#allocation2] sm:$0xff]  ;;  %v384_v16 = vld [vmem:[#allocation2 + $0x8] sm:$0xf] }
  0xb4   : > { %388 = vrot.lane.b32.xlu0 %v383_v12, %s1128_s14  ;;  %v387_v15 = vcombine.high %v383_v12, %v383_v12  ;;  %v296_v18 = vsel %vm1305_vm7, %v383_v12, 0.0  ;;  %v410_v19 = vld [vmem:[#allocation2 + $0x8] sm:$0xf]  ;;  %v433_v23 = vcombine.low %v383_v12, %v383_v12 }
  0xb5   : > { %298 = vst [vmem:[#allocation4 + $0x30] sm:$0xf] %v296_v18  ;;  %v340_v20 = vld [vmem:[#allocation2 + $0x8] sm:$0xf] }
  0xb6   : > { %v297_v17 = vsel %vm1299_vm6, %v387_v15, 0.0  ;;  %v366_v21 = vld [vmem:[#allocation2 + $0x8] sm:$0xf] }
  0xb7   : > { %392 = vrot.lane.b32.xlu1 %v384_v16, %s1128_s14  ;;  %299 = vst [vmem:[#allocation4] sm:$0xf] %v297_v17  ;;  %v320_v22 = vld [vmem:[#allocation2 + $0x8] sm:$0xf] }
  0xb8   : > { %437 = vrot.lane.b32.xlu0 %v383_v12, %s1129_s16  ;;  %v1024_v24 = vld [vmem:[#allocation2 + $0x8] ss:$0 sps:$4 sm:$0xff]  }
  0xb9   : > { %v1025_v25 = vld [vmem:[#allocation2 + $0x8] ss:$0 sps:$4 sm:$0xff]  }
  0xbb   : > { %418 = vrot.lane.b32.xlu1 %v410_v19, %s1130_s25 }
  0xbc   : > { %370 = vrot.lane.b32.xlu0 %v383_v12, %s1131_s26 }
  0xbf   : > { %348 = vrot.lane.b32.xlu1 %v340_v20, %s1132_s28 }
  0xc0   : > { %308 = vrot.lane.b32.xlu0 %v383_v12, %s1133_s8 }
  0xc3   : > { %374 = vrot.lane.b32.xlu1 %v366_v21, %s1131_s26 }
  0xc4   : > { %455 = vrot.lane.b32.xlu0 %v387_v15, %s1127_s29 }
  0xc7   : > { %328 = vrot.lane.b32.xlu1 %v320_v22, %s1134_s7 }
  0xc8   : > { %390 = vrot.lane.b32.xlu0 %v387_v15, %s1128_s14 }
  0xcb   : > { %453 = vrot.lane.b32.xlu1 %v383_v12, %s1127_s29 }
  0xcc   : > { %416 = vrot.lane.b32.xlu0 %v387_v15, %s1130_s25 }
  0xcf   : > { %414 = vrot.lane.b32.xlu1 %v383_v12, %s1130_s25 }
  0xd0   : > { %346 = vrot.lane.b32.xlu0 %v387_v15, %s1132_s28 }
  0xd3   : > { %344 = vrot.lane.b32.xlu1 %v383_v12, %s1132_s28 }
  0xd4   : > { %435 = vrot.lane.b32.xlu0 %v433_v23, %s1129_s16 }
  0xd7   : > { %439 = vrot.lane.b32.xlu1 %v1024_v24, %s1129_s16 }
  0xd8   : > { %372 = vrot.lane.b32.xlu0 %v387_v15, %s1131_s26 }
  0xdb   : > { %324 = vrot.lane.b32.xlu1 %v383_v12, %s1134_s7 }
  0xdc   : > { %326 = vrot.lane.b32.xlu0 %v387_v15, %s1134_s7 }
  0xdf   : > { %310 = vrot.lane.b32.xlu1 %v1025_v25, %s1133_s8 }
  0xe0   : > { %306 = vrot.lane.b32.xlu0 %v433_v23, %s1133_s8 }
  0xe3   : > { %482 = vperm.xlu1 %1020, %v479_v27  }
 0x125   : > { %v458_v28 = vpop.permute.xlu1 %457 }
 0x126   : > { %v389_v29 = vpop.permute.xlu0 %388 }
 0x129   : > { %v393_v30 = vpop.permute.xlu1 %392 }
 0x12a   : > { %v438_v31 = vpop.permute.xlu0 %437 }
 0x12d   : > { %v419_v32 = vpop.permute.xlu1 %418 }
 0x12e   : > { %v371_v33 = vpop.permute.xlu0 %370 }
 0x131   : > { %v349_v34 = vpop.permute.xlu1 %348 }
 0x132   : > { %v1339_v35 = vpop.permute.xlu0 %308 }
 0x135   : > { %v375_v36 = vpop.permute.xlu1 %374 }
 0x136   : > { %v456_v38 = vpop.permute.xlu0 %455 }
 0x137   : > { %v461_v39 = vsel %vm459_vm8, %v456_v38, %v458_v28 }
 0x138   : > { %v465_v40 = vsel %vm1343_vm9, %v461_v39, 0.0 }
 0x139   : > { %467 = vst [vmem:[#allocation4 + $0x38] sm:$0xf] %v465_v40  ;;  %v329_v41 = vpop.permute.xlu1 %328 }
 0x13a   : > { %v391_v43 = vpop.permute.xlu0 %390 }
 0x13b   : > { %v395_v44 = vsel %vm394_vm10, %v389_v29, %v391_v43  ;;  %v396_v45 = vsel %vm394_vm10, %v391_v43, %v393_v30 }
 0x13c   : > { %v399_v46 = vsel %vm1352_vm11, %v395_v44, 0.0  ;;  %v400_v47 = vsel %vm1343_vm9, %v396_v45, 0.0 }
 0x13d   : > { %v403_v48 = vrot.slane %v399_v46, 4  ;;  %v404_v49 = vrot.slane %v400_v47, 4  ;;  %v454_v50 = vpop.permute.xlu1 %453 }
 0x13e   : > { %v460_v51 = vsel %vm459_vm8, %v454_v50, %v456_v38  ;;  %v417_v52 = vpop.permute.xlu0 %416 }
 0x13f   : > { %407 = vst [vmem:[#allocation4 + $0x48] sm:$0xf0] %v403_v48  ;;  %408 = vst [vmem:[#allocation4 + $0x28] sm:$0xf0] %v404_v49  ;;  %v464_v53 = vsel %vm1352_vm11, %v460_v51, 0.0  ;;  %v422_v54 = vsel %vm420_vm12, %v417_v52, %v419_v32 }
 0x140   : > { %466 = vst [vmem:[#allocation4 + $0x40] sm:$0xf] %v464_v53  ;;  %v426_v55 = vsel %vm1299_vm6, %v422_v54, 0.0  ;;  %v478_v56 = vld [vmem:[#allocation4 + $0x38] sm:$0xf] }
 0x141   : > { %428 = vst [vmem:[#allocation4 + $0x20] sm:$0xf] %v426_v55  ;;  %v415_v57 = vpop.permute.xlu1 %414  ;;  %950 = vmatprep.subr.msk.mxu0 %vm1527_vm13, %v478_v56 }
 0x142   : > { %v421_v58 = vsel %vm420_vm12, %v415_v57, %v417_v52  ;;  %v347_v59 = vpop.permute.xlu0 %346 }
 0x143   : > { %v425_v60 = vsel %vm1305_vm7, %v421_v58, 0.0  ;;  %v352_v61 = vsel %vm350_vm14, %v347_v59, %v349_v34 }
 0x144   : > { %427 = vst [vmem:[#allocation4 + $0x8] sm:$0xf] %v425_v60  ;;  %v356_v62 = vsel %vm1299_vm6, %v352_v61, 0.0  ;;  %v759_v60 = vld [vmem:[%s1523_s4] sm:$0xf] }
 0x145   : > { %v360_v63 = vrot.slane %v356_v62, 4  ;;  %v345_v0 = vpop.permute.xlu1 %344 }
 0x146   : > { %v351_v2 = vsel %vm350_vm14, %v345_v0, %v347_v59  ;;  %v436_v3 = vpop.permute.xlu0 %435 }
 0x147   : > { %364 = vst [vmem:[#allocation4 + $0x10] sm:$0xf0] %v360_v63  ;;  %v355_v4 = vsel %vm1305_vm7, %v351_v2, 0.0  ;;  %v442_v6 = vsel %vm441_vm15, %v436_v3, %v438_v31  ;;  %v477_v7 = vld [vmem:[#allocation4 + $0x40] sm:$0xf] }
 0x148   : > { %v359_v8 = vrot.slane %v355_v4, 4  ;;  %446 = vst [vmem:[#allocation4 + $0x8] sm:$0xf0] %v442_v6  ;;  %951 = vmatpush1.msk.msra.mxu0 %vm1527_vm13, %v477_v7  ;;  %vm485_vm13 = vcmask 293888  }
 0x149   : > { %v440_v9 = vpop.permute.xlu1 %439 }
 0x14a   : > { %363 = vst [vmem:[#allocation4 + $0x18] sm:$0xf0] %v359_v8  ;;  %v443_v10 = vsel %vm441_vm15, %v438_v31, %v440_v9  ;;  %v373_v11 = vpop.permute.xlu0 %372 }
 0x14b   : > { %447 = vst [vmem:[#allocation4 + $0x20] sm:$0xf0] %v443_v10  ;;  %v377_v12 = vsel %vm376_vm1, %v371_v33, %v373_v11  ;;  %v378_v15 = vsel %vm376_vm1, %v373_v11, %v375_v36  ;;  %v468_v33 = vld [vmem:[%s1520_s1] sm:$0xf] }
 0x14c   : > { %381 = vst [vmem:[#allocation4 + $0x48] sm:$0xf] %v377_v12  ;;  %382 = vst [vmem:[#allocation4 + $0x28] sm:$0xf] %v378_v15 }
 0x14d   : > { %v325_v16 = vpop.permute.xlu1 %324 }
 0x14e   : > { %v327_v17 = vpop.permute.xlu0 %326 }
 0x14f   : > { %v331_v18 = vsel %vm330_vm2, %v325_v16, %v327_v17  ;;  %v332_v19 = vsel %vm330_vm2, %v327_v17, %v329_v41  ;;  %v475_v27 = vld [vmem:[#allocation4 + $0x8] sm:$0xff] }
 0x150   : > { %v335_v20 = vsel %vm1352_vm11, %v331_v18, 0.0  ;;  %v336_v21 = vsel %vm1343_vm9, %v332_v19, 0.0 }
 0x151   : > { %337 = vst [vmem:[#allocation4 + $0x18] sm:$0xf] %v335_v20  ;;  %338 = vst [vmem:[#allocation4 + $0x10] sm:$0xf] %v336_v21  ;;  %v311_v22 = vpop.permute.xlu1 %310 }
 0x152   : > { %v314_v23 = vsel %vm312_vm3, %v1339_v35, %v311_v22  ;;  %v307_v24 = vpop.permute.xlu0 %306  ;;  %v476_v25 = vld [vmem:[#allocation4 + $0x20] sm:$0xff] }
 0x153   : > { %318 = vst [vmem:[#allocation4] sm:$0xf0] %v314_v23  ;;  %v313_v26 = vsel %vm312_vm3, %v307_v24, %v1339_v35  ;;  %520 = vmatprep.subr.mxu0 %v476_v25  ;;  %v474_v28 = vld [vmem:[#allocation4 + $0x28] sm:$0xff] }
 0x154   : > { %317 = vst [vmem:[#allocation4 + $0x30] sm:$0xf0] %v313_v26  ;;  %521 = vmatpush1.msra.mxu0 %v475_v27  ;;  %v473_v29 = vld [vmem:[#allocation4 + $0x48] sm:$0xff] }
 0x155   : > { %522 = vmatprep.subr.mxu0 %v474_v28 }
 0x156   : > { %523 = vmatpush1.msra.mxu0 %v473_v29 }
 0x158   : > { %v472_v30 = vld [vmem:[#allocation4 + $0x10] sm:$0xff]  ;;  %v471_v31 = vld [vmem:[#allocation4 + $0x18] sm:$0xff] }
 0x159   : > { %524 = vmatprep.subr.mxu0 %v472_v30 }
 0x15a   : > { %525 = vmatpush1.msra.mxu0 %v471_v31  ;;  %v470_v32 = vld [vmem:[#allocation4] sm:$0xff] }
 0x15b   : > { %526 = vmatprep.subr.mxu0 %v470_v32  ;;  %v469_v34 = vld [vmem:[#allocation4 + $0x30] sm:$0xff] }
 0x15c   : > { %527 = vmatpush1.msra.mxu0 %v469_v34 }
 0x15d   : > { %952 = vmatmul.mubr.msk.f32.vlgmr.msra.gmra.mxu0 %vm485_vm13, %v468_v33 }
 0x15e   : > { %v483_v35 = vpop.permute.xlu1 %482 }
 0x21d   : > { %v562_v36 = vpop.f32.mrf.mxu0 }
 0x21e   : > { %v563_v38 = vadd.f32 %v562_v36, %v483_v35 }
 0x21f   : > { %v564_v39 = vpop.f32.mrf.mxu0 }
 0x220   : > { %v565_v40 = vadd.f32 %v564_v39, %v483_v35  ;;  %v567_v41 = vmax.f32 %v563_v38, 0.0 }
 0x222   : > { %v568_v43 = vmax.f32 %v565_v40, 0.0 }
 0x224   : > { %v571_v44 = vcombine.low %v567_v41, %v568_v43 }
 0x226   : > { %572 = vrot.lane.b32.xlu0 %v571_v44, %s1126_s12 }
 0x298   : > { %v573_v45 = vpop.permute.xlu0 %572 }
 0x299   : > { %v574_v46 = vrot.slane %v573_v45, 4 }
 0x29b   : > { %v575_v47 = vsel %vm283_vm4, %v574_v46, %v573_v45  ;;  %579 = vst.msk [vmem:[#allocation3 + $0x8] sm:$0xf] %vm241_vm0, %v574_v46  ;;  %vm1546_vm0 = vcmask 1043456  }
 0x29c   : > { %578 = vst.msk [vmem:[#allocation3] sm:$0xff] %vm1283_vm5, %v575_v47  ;;  %vm1547_vm4 = vmmov %vm1546_vm0 }
 0x2a2   : > { %v730_v48 = vld [vmem:[#allocation3 + $0x8] sm:$0xf] }
 0x2a3   : > { %v668_v49 = vld [vmem:[#allocation3 + $0x8] sm:$0xf]  ;;  %v580_v50 = vld [vmem:[#allocation3] sm:$0xff]  ;;  %738 = vrot.lane.b32.xlu0 %v730_v48, %s1127_s29 }
 0x2a4   : > { %676 = vrot.lane.b32.xlu1 %v668_v49, %s1128_s14  ;;  %v582_v51 = vcombine.high %v580_v50, %v580_v50  ;;  %v584_v52 = vsel %vm1305_vm7, %v580_v50, 0.0  ;;  %v693_v53 = vld [vmem:[#allocation3 + $0x8] sm:$0xf]  ;;  %v715_v57 = vcombine.low %v580_v50, %v580_v50 }
 0x2a5   : > { %586 = vst [vmem:[#allocation4 + $0x30] sm:$0xf] %v584_v52  ;;  %v626_v5 = vld [vmem:[#allocation3 + $0x8] sm:$0xf] }
 0x2a6   : > { %v585_v54 = vsel %vm1299_vm6, %v582_v51, 0.0  ;;  %v651_v55 = vld [vmem:[#allocation3 + $0x8] sm:$0xf] }
 0x2a7   : > { %672 = vrot.lane.b32.xlu0 %v580_v50, %s1128_s14  ;;  %587 = vst [vmem:[#allocation4] sm:$0xf] %v585_v54  ;;  %v1028_v56 = vld [vmem:[#allocation3 + $0x8] ss:$0 sps:$4 sm:$0xff]  }
 0x2a8   : > { %701 = vrot.lane.b32.xlu1 %v693_v53, %s1130_s25  ;;  %v607_v58 = vld [vmem:[#allocation3 + $0x8] sm:$0xf] }
 0x2a9   : > { %v1029_v59 = vld [vmem:[#allocation3 + $0x8] ss:$0 sps:$4 sm:$0xff]  }
 0x2ab   : > { %719 = vrot.lane.b32.xlu0 %v580_v50, %s1129_s16 }
 0x2ac   : > { %634 = vrot.lane.b32.xlu1 %v626_v5, %s1132_s28 }
 0x2af   : > { %655 = vrot.lane.b32.xlu0 %v580_v50, %s1131_s26 }
 0x2b0   : > { %659 = vrot.lane.b32.xlu1 %v651_v55, %s1131_s26 }
 0x2b3   : > { %596 = vrot.lane.b32.xlu0 %v580_v50, %s1133_s8 }
 0x2b4   : > { %734 = vrot.lane.b32.xlu1 %v580_v50, %s1127_s29 }
 0x2b7   : > { %674 = vrot.lane.b32.xlu0 %v582_v51, %s1128_s14 }
 0x2b8   : > { %697 = vrot.lane.b32.xlu1 %v580_v50, %s1130_s25 }
 0x2bb   : > { %699 = vrot.lane.b32.xlu0 %v582_v51, %s1130_s25  ;;  %s240_s25 = scalar_lea.vmem [#allocation8], %s948_s17 }
 0x2bc   : > { %630 = vrot.lane.b32.xlu1 %v580_v50, %s1132_s28 }
 0x2bf   : > { %632 = vrot.lane.b32.xlu0 %v582_v51, %s1132_s28 }
 0x2c0   : > { %721 = vrot.lane.b32.xlu1 %v1028_v56, %s1129_s16 }
 0x2c3   : > { %717 = vrot.lane.b32.xlu0 %v715_v57, %s1129_s16  ;;  %s962_s16 = sshll.u32 %s1188_s22, 7  ;;  %s1136_s22 = smov [#allocation8]  }
 0x2c4   : > { %736 = vrot.lane.b32.xlu1 %v582_v51, %s1127_s29  ;;  %s1062_s11 = sshll.u32 %s1136_s22, 4  ;;  %s1063_s11 = int_to_ptr.vmem [resolvable:$false] %s1062_s11 }
 0x2c5   : > { %s1064_s17 = scalar_lea.vmem %s1063_s11, 256 }
 0x2c7   : > { %657 = vrot.lane.b32.xlu0 %v582_v51, %s1131_s26  ;;  %s871_s26 = sshll.u32 %s240_s25, 4  ;;  %s872_s26 = int_to_ptr.vmem [resolvable:$true] %s871_s26 }
 0x2c8   : > { %615 = vrot.lane.b32.xlu1 %v607_v58, %s1134_s7  ;;  %s1058_s10 = scalar_lea.vmem %s872_s26, 128  ;;  %p1065_p3 = scmp.lt.s32.totalorder %s872_s26, %s1063_s11 }
 0x2c9   : > { %p1059_p11 = scmp.ne.s32.totalorder %s872_s26, %s1058_s10  ;;  %p1066_p5 = scmp.lt.s32.totalorder %s1064_s17, %s1058_s10 }
 0x2cb   : > { %613 = vrot.lane.b32.xlu0 %v582_v51, %s1134_s7  ;;  %p1060_p13 = pnand %p1059_p11, %p1548_p12  ;;  %p1067_p8 = por %p1066_p5, %p1065_p3 }
 0x2cc   : > { %611 = vrot.lane.b32.xlu1 %v580_v50, %s1134_s7  ;;  %s869_s7 = scalar_lea.hbm %s1524_s5, %s962_s16 }
 0x2cd   : > { %p1061_p1 = pneg %p1060_p13 }
 0x2cf   : > { %594 = vrot.lane.b32.xlu0 %v715_v57, %s1133_s8  ;;  %p1068_p10 = pnand %p1067_p8, %p1061_p1 }
 0x2d0   : > { %598 = vrot.lane.b32.xlu1 %v1029_v59, %s1133_s8 }
 0x2d4   : > { %762 = vperm.xlu1 %1020, %v759_v60  }
 0x315   : > { %v739_v61 = vpop.permute.xlu0 %738 }
 0x316   : > { %v677_v62 = vpop.permute.xlu1 %676 }
 0x319   : > { %v673_v0 = vpop.permute.xlu0 %672 }
 0x31a   : > { %v702_v63 = vpop.permute.xlu1 %701 }
 0x31d   : > { %v720_v3 = vpop.permute.xlu0 %719 }
 0x31e   : > { %v635_v2 = vpop.permute.xlu1 %634 }
 0x321   : > { %v656_v6 = vpop.permute.xlu0 %655 }
 0x322   : > { %v660_v4 = vpop.permute.xlu1 %659 }
 0x325   : > { %v1433_v8 = vpop.permute.xlu0 %596 }
 0x326   : > { %v735_v7 = vpop.permute.xlu1 %734 }
 0x329   : > { %v675_v10 = vpop.permute.xlu0 %674 }
 0x32a   : > { %v698_v9 = vpop.permute.xlu1 %697  ;;  %v678_v11 = vsel %vm394_vm10, %v673_v0, %v675_v10  ;;  %v679_v12 = vsel %vm394_vm10, %v675_v10, %v677_v62  ;;  %v748_v62 = vld [vmem:[%s1522_s3] sm:$0xf] }
 0x32b   : > { %v682_v15 = vsel %vm1352_vm11, %v678_v11, 0.0  ;;  %v683_v16 = vsel %vm1343_vm9, %v679_v12, 0.0 }
 0x32c   : > { %v686_v17 = vrot.slane %v682_v15, 4  ;;  %v687_v18 = vrot.slane %v683_v16, 4 }
 0x32d   : > { %v700_v20 = vpop.permute.xlu0 %699 }
 0x32e   : > { %v631_v19 = vpop.permute.xlu1 %630  ;;  %690 = vst [vmem:[#allocation4 + $0x48] sm:$0xf0] %v686_v17  ;;  %691 = vst [vmem:[#allocation4 + $0x28] sm:$0xf0] %v687_v18  ;;  %v703_v21 = vsel %vm420_vm12, %v698_v9, %v700_v20  ;;  %v704_v22 = vsel %vm420_vm12, %v700_v20, %v702_v63 }
 0x32f   : > { %v707_v23 = vsel %vm1305_vm7, %v703_v21, 0.0  ;;  %v708_v24 = vsel %vm1299_vm6, %v704_v22, 0.0 }
 0x330   : > { %709 = vst [vmem:[#allocation4 + $0x8] sm:$0xf] %v707_v23  ;;  %710 = vst [vmem:[#allocation4 + $0x20] sm:$0xf] %v708_v24 }
 0x331   : > { %v633_v26 = vpop.permute.xlu0 %632 }
 0x332   : > { %v722_v25 = vpop.permute.xlu1 %721  ;;  %v636_v28 = vsel %vm350_vm14, %v631_v19, %v633_v26  ;;  %v637_v29 = vsel %vm350_vm14, %v633_v26, %v635_v2 }
 0x333   : > { %v724_v27 = vsel %vm441_vm15, %v720_v3, %v722_v25  ;;  %v640_v30 = vsel %vm1305_vm7, %v636_v28, 0.0  ;;  %v641_v31 = vsel %vm1299_vm6, %v637_v29, 0.0 }
 0x334   : > { %728 = vst [vmem:[#allocation4 + $0x20] sm:$0xf0] %v724_v27  ;;  %v644_v32 = vrot.slane %v640_v30, 4  ;;  %v645_v33 = vrot.slane %v641_v31, 4 }
 0x335   : > { %v718_v35 = vpop.permute.xlu0 %717 }
 0x336   : > { %v737_v34 = vpop.permute.xlu1 %736  ;;  %648 = vst [vmem:[#allocation4 + $0x18] sm:$0xf0] %v644_v32  ;;  %649 = vst [vmem:[#allocation4 + $0x10] sm:$0xf0] %v645_v33  ;;  %v723_v39 = vsel %vm441_vm15, %v718_v35, %v720_v3  ;;  %v847_v3 = vcombine.high %v1277_v1, %v1277_v1 }
 0x337   : > { %v740_v36 = vsel %vm459_vm8, %v735_v7, %v737_v34  ;;  %v741_v38 = vsel %vm459_vm8, %v737_v34, %v739_v61  ;;  %727 = vst [vmem:[#allocation4 + $0x8] sm:$0xf0] %v723_v39 }
 0x338   : > { %v744_v40 = vsel %vm1352_vm11, %v740_v36, 0.0  ;;  %v745_v14 = vsel %vm1343_vm9, %v741_v38, 0.0 }
 0x339   : > { %746 = vst [vmem:[#allocation4 + $0x40] sm:$0xf] %v744_v40  ;;  %747 = vst [vmem:[#allocation4 + $0x38] sm:$0xf] %v745_v14  ;;  %v658_v41 = vpop.permute.xlu0 %657 }
 0x33a   : > { %v616_v13 = vpop.permute.xlu1 %615  ;;  %v661_v43 = vsel %vm376_vm1, %v656_v6, %v658_v41  ;;  %v662_v44 = vsel %vm376_vm1, %v658_v41, %v660_v4 }
 0x33b   : > { %665 = vst [vmem:[#allocation4 + $0x48] sm:$0xf] %v661_v43  ;;  %666 = vst [vmem:[#allocation4 + $0x28] sm:$0xf] %v662_v44  ;;  %v756_v5 = vld [vmem:[#allocation4 + $0x20] sm:$0xff] }
 0x33d   : > { %v614_v46 = vpop.permute.xlu0 %613 }
 0x33e   : > { %v612_v45 = vpop.permute.xlu1 %611  ;;  %v618_v48 = vsel %vm330_vm2, %v614_v46, %v616_v13  ;;  %v755_v37 = vld [vmem:[#allocation4 + $0x8] sm:$0xff] }
 0x33f   : > { %v617_v47 = vsel %vm330_vm2, %v612_v45, %v614_v46  ;;  %v622_v50 = vsel %vm1343_vm9, %v618_v48, 0.0 }
 0x340   : > { %v621_v49 = vsel %vm1352_vm11, %v617_v47, 0.0  ;;  %v758_v51 = vld [vmem:[#allocation4 + $0x38] sm:$0xf]  ;;  %v757_v52 = vld [vmem:[#allocation4 + $0x40] sm:$0xf] }
 0x341   : > { %623 = vst [vmem:[#allocation4 + $0x18] sm:$0xf] %v621_v49  ;;  %624 = vst [vmem:[#allocation4 + $0x10] sm:$0xf] %v622_v50  ;;  %953 = vmatprep.subr.msk.mxu1 %vm1546_vm0, %v758_v51  ;;  %v595_v54 = vpop.permute.xlu0 %594 }
 0x342   : > { %954 = vmatpush1.msk.msra.mxu1 %vm1547_vm4, %v757_v52  ;;  %v599_v53 = vpop.permute.xlu1 %598  ;;  %v600_v42 = vsel %vm312_vm3, %v595_v54, %v1433_v8  ;;  %v754_v56 = vld [vmem:[#allocation4 + $0x28] sm:$0xff] }
 0x343   : > { %v601_v55 = vsel %vm312_vm3, %v1433_v8, %v599_v53  ;;  %798 = vmatprep.subr.mxu1 %v756_v5  ;;  %604 = vst [vmem:[#allocation4 + $0x30] sm:$0xf0] %v600_v42  ;;  %v753_v57 = vld [vmem:[#allocation4 + $0x48] sm:$0xff] }
 0x344   : > { %605 = vst [vmem:[#allocation4] sm:$0xf0] %v601_v55  ;;  %799 = vmatpush1.msra.mxu1 %v755_v37 }
 0x345   : > { %800 = vmatprep.subr.mxu1 %v754_v56 }
 0x346   : > { %801 = vmatpush1.msra.mxu1 %v753_v57 }
 0x348   : > { %v752_v58 = vld [vmem:[#allocation4 + $0x10] sm:$0xff]  ;;  %v751_v59 = vld [vmem:[#allocation4 + $0x18] sm:$0xff] }
 0x349   : > { %802 = vmatprep.subr.mxu1 %v752_v58 }
 0x34a   : > { %803 = vmatpush1.msra.mxu1 %v751_v59  ;;  %v749_v61 = vld [vmem:[#allocation4 + $0x30] sm:$0xff] }
 0x34b   : > { %v750_v60 = vld [vmem:[#allocation4] sm:$0xff] }
 0x34c   : > { %804 = vmatprep.subr.mxu1 %v750_v60 }
 0x34d   : > { %805 = vmatpush1.msra.mxu1 %v749_v61 }
 0x34e   : > { %955 = vmatmul.mubr.msk.f32.vlgmr.msra.gmra.mxu1 %vm485_vm13, %v748_v62 }
 0x34f   : > { %v763_v63 = vpop.permute.xlu1 %762 }
 0x40e   : > { %v840_v0 = vpop.f32.mrf.mxu1 }
 0x40f   : > { %v841_v2 = vadd.f32 %v840_v0, %v763_v63 }
 0x410   : > { %v842_v4 = vpop.f32.mrf.mxu1 }
 0x411   : > { %v843_v6 = vadd.f32 %v842_v4, %v763_v63  ;;  %v849_v7 = vadd.f32 %v841_v2, %v1277_v1 }
 0x413   : > { %v850_v8 = vadd.f32 %v847_v3, %v843_v6 }
 0x415   : > { %v853_v9 = vcombine.low %v849_v7, %v850_v8 }
 0x417   : > { %855 = vst [vmem:[%s240_s25] sm:$0xff] %v853_v9 }
 0x418   : > { %1071 = shalt.err (!%p1068_p10)
}
 0x419   : > { %s1072_s23 = scalar_lea.hbm %s869_s7, 128  ;;  %s1076_s12 = scalar_lea.hbm %s1524_s5, 256 }
 0x41a   : > { %p1073_p2 = scmp.ne.s32.totalorder %s869_s7, %s1072_s23  ;;  %p1077_p7 = scmp.lt.s32.totalorder %s869_s7, %s1524_s5 }
 0x41b   : > { %p1078_p0 = scmp.lt.s32.totalorder %s1076_s12, %s1072_s23 }
 0x41c   : > { %p1074_p4 = pnand %p1073_p2, %p1548_p12 }
 0x41d   : > { %p1079_p6 = por %p1078_p0, %p1077_p7 }
 0x41e   : > { %p1075_p9 = pneg %p1074_p4 }
 0x420   : > { %p1080_p11 = pnand %p1079_p6, %p1075_p9 }
 0x422   : > { %1083 = shalt.err (!%p1080_p11)
}
 0x423   : > { %965 = dma.vmem_to_hbm [thread:$0]  (%p1548_p12), %s872_s26, 128, %s869_s7, %s857_s9  }
 0x424 PF: > { %s883_s16 = sand.u32 1, %s1110_s18   ;;  %p1549_p13 = scmp.ne.s32.totalorder %s1531_s6, 0 }
 0x425   : > { %p1550_p1 = scmp.ge.s32.totalorder %s1122_s21, 2  ;;  %s884_s25 = scalar_lea.sflag [#allocation7], %s883_s16 }
 0x427   : > { %p972_p3 = pnand %p1550_p1, %p1549_p13 }
 0x429   : > { %p973_p5 = pneg %p972_p3 }
 0x42b   : > { %1105 = dma.done.wait (%p973_p5), %s884_s25, 128  }
 0x42c   : > { %1107 = vsyncadd (%p973_p5), %s884_s25, 4294967168  ;;  %p18_p8 = scmp.ge.s32.totalorder %s1192_s24, 4   ;;  %s1551_s18 = smov %s1114_s19 }
 0x42d   : > { %s1552_s19 = smov %s1118_s20  ;;  %s1553_s20 = smov %s1204_s27 }
 0x42e   : > { %s1554_s21 = smov %s1192_s24  ;;  %20 = sbr.rel (!%p18_p8) target bundleno = 5 (0x5), region = 85 }
 0x433   :  { %889 = vsyncpa [#allocation6], 1 }
 0x434   :  { %891 = vsyncpa [#allocation6 + $0x1], 1 }
 0x435   :  { %892 = vsyncpa [#allocation7], 1 }
 0x436   :  { %894 = vsyncpa [#allocation7 + $0x1], 1 }

</bundles_post_ra>
